<compile_context>
chip_gen: v5e
topology: v5e:2x2
jax: 0.10.0
libtpu: 0.0.40
codegen_flags: <defaults>
</compile_context>

<pallas_src>
import functools
import math

import jax
import jax.numpy as jnp
from jax.experimental import pallas as pl
from jax.experimental.pallas import tpu as pltpu


def _lml_kernel(mu_ref, y_ref, l_ref, out_ref, z_ref, logdet_ref, *, n_real: int):
    """One grid step == one (B, Np) row panel of L (panels are serial)."""
    B, Np = l_ref.shape
    p = pl.program_id(0)
    num_panels = pl.num_programs(0)
    i0 = p * B
    f32 = jnp.float32

    @pl.when(p == 0)
    def _init():
        z_ref[...] = jnp.zeros_like(z_ref)
        logdet_ref[...] = jnp.zeros_like(logdet_ref)

    panel = l_ref[...].astype(f32)                                   # (B, Np)
    row = jax.lax.broadcasted_iota(jnp.int32, (B, Np), 0)
    col = jax.lax.broadcasted_iota(jnp.int32, (B, Np), 1)

    # Keep only the lower trapezoid of this panel (col <= global row index).
    # Robust against NaN/garbage in L's strictly-upper triangle.
    pm = jnp.where(col <= i0 + row, panel, 0.0)                      # (B, Np)

    # ---- prefix contribution: s[b] = sum_{j < i0} L[i0+b, j] * z[j] --------
    # z lanes >= i0 are still zero, so no extra prefix mask is needed.
    zrow = z_ref[...]                                                # (1, Np) f32
    s_pre = jnp.sum(pm * zrow, axis=1, keepdims=True)                # (B, 1)

    # ---- extract the BxB diagonal block with a tiny one-hot MXU matmul -----
    jidx = jax.lax.broadcasted_iota(jnp.int32, (Np, B), 0)
    midx = jax.lax.broadcasted_iota(jnp.int32, (Np, B), 1)
    onehot = (jidx == i0 + midx).astype(f32)                         # (Np, B)
    dblk = jnp.dot(pm, onehot, preferred_element_type=f32)           # (B, B)

    # diag / logdet / reciprocal folded into this same panel pass.
    rloc = jax.lax.broadcasted_iota(jnp.int32, (B, B), 0)
    cloc = jax.lax.broadcasted_iota(jnp.int32, (B, B), 1)
    diag = jnp.sum(jnp.where(rloc == cloc, dblk, 0.0),
                   axis=1, keepdims=True)                            # (B, 1)
    logdet_ref[...] = logdet_ref[...] + jnp.reshape(jnp.sum(jnp.log(diag)), (1, 1))
    inv_diag = 1.0 / diag                                            # exact, vectorized

    # ---- fully unrolled BxB forward solve (serial part, all in vregs) ------
    rhs = (y_ref[...].astype(f32) - mu_ref[...].astype(f32)) - s_pre  # (B, 1)
    rowb = jax.lax.broadcasted_iota(jnp.int32, (B, 1), 0)
    lane = jax.lax.broadcasted_iota(jnp.int32, (1, Np), 1)
    zblk_row = jnp.zeros((1, Np), f32)
    for k in range(B):                                               # static unroll
        zk = rhs[k, 0] * inv_diag[k, 0]                              # scalar
        colk = dblk[:, k:k + 1]                                      # (B, 1)
        rhs = rhs - jnp.where(rowb > k, colk, 0.0) * zk              # trailing update
        zblk_row = jnp.where(lane == i0 + k, zk, zblk_row)

    z_ref[...] = zrow + zblk_row                                     # disjoint lanes

    # ---- finalize: quad = ||L^{-1} r||^2 == r^T (L L^T)^{-1} r -------------
    @pl.when(p == num_panels - 1)
    def _finalize():
        z = z_ref[...]
        quad = jnp.sum(z * z)
        const = 0.5 * n_real * math.log(2.0 * math.pi)
        val = jnp.reshape(-0.5 * quad - const, (1, 1)) - logdet_ref[...]
        out_ref[...] = val.astype(out_ref.dtype)


def log_marginal_likelihood(mu, L, y, *, panel: int = 8):
    """Pallas equivalent of LogMarginalLikelihood.forward(mu, L, y) -> (1, 1)."""
    y_col = y.T.reshape(-1, 1)
    assert mu.shape == y_col.shape, (mu.shape, y_col.shape)
    n = y_col.shape[0]
    assert L.shape == (n, n), L.shape

    B = panel
    n_pad = ((n + B - 1) // B) * B
    if n_pad != n:
        pad = n_pad - n
        mu_p = jnp.pad(mu, ((0, pad), (0, 0)))
        y_p = jnp.pad(y_col, ((0, pad), (0, 0)))
        L_p = jnp.pad(L, ((0, pad), (0, pad)))
        # Unit diagonal on padded rows -> z = 0 and log(diag) = 0 there.
        L_p = L_p.at[jnp.arange(n, n_pad), jnp.arange(n, n_pad)].set(1.0)
    else:
        mu_p, y_p, L_p = mu, y_col, L

    num_panels = n_pad // B
    kernel = functools.partial(_lml_kernel, n_real=n)

    # L is streamed panel-by-panel from HBM by the BlockSpec pipeline, so the
    # default scoped-VMEM limit is never binding (per-panel footprint ~64*N B).
    return pl.pallas_call(
        kernel,
        out_shape=jax.ShapeDtypeStruct((1, 1), mu.dtype),
        grid_spec=pltpu.PrefetchScalarGridSpec(
            num_scalar_prefetch=0,
            grid=(num_panels,),
            in_specs=[
                pl.BlockSpec((B, 1), lambda p: (p, 0)),        # mu row panel
                pl.BlockSpec((B, 1), lambda p: (p, 0)),        # y  row panel
                pl.BlockSpec((B, n_pad), lambda p: (p, 0)),    # L  row panel (streamed)
            ],
            out_specs=pl.BlockSpec((1, 1), lambda p: (0, 0)),
            scratch_shapes=[
                pltpu.VMEM((1, n_pad), jnp.float32),           # solved z (lane-dense)
                pltpu.VMEM((1, 1), jnp.float32),               # running sum(log diag L)
            ],
        ),
        compiler_params=pltpu.CompilerParams(
            dimension_semantics=("arbitrary",),                # panels are a serial recurrence
        ),
    )(mu_p, y_p, L_p)


def _reference(mu, L, y):
    # Pure-JAX reference mirroring the PyTorch forward exactly.
    y_col = y.T.reshape(-1, 1)
    r = y_col - mu
    z = jax.scipy.linalg.solve_triangular(L, r, lower=True)
    alpha = jax.scipy.linalg.solve_triangular(L.T, z, lower=False)
    N = y_col.shape[0]
    return (-0.5 * (r.T @ alpha)
            - jnp.sum(jnp.log(jnp.diag(L)))
            - N * 0.5 * math.log(2.0 * math.pi))


if __name__ == "__main__":
    key = jax.random.PRNGKey(0)
    k1, k2, k3 = jax.random.split(key, 3)

    # y: (num_points, num_outputs) -> flattened N = 64 latent targets
    n_points, n_outputs = 16, 4
    N = n_points * n_outputs

    y = jax.random.normal(k1, (n_points, n_outputs), dtype=jnp.float32)
    mu = 0.1 * jax.random.normal(k2, (N, 1), dtype=jnp.float32)

    # Deterministic, well-conditioned lower-triangular Cholesky-like factor.
    A = jax.random.normal(k3, (N, N), dtype=jnp.float32)
    L = jnp.tril(A, -1) * 0.05 + jnp.diag(1.0 + jnp.abs(jnp.diag(A)))

    out = log_marginal_likelihood(mu, L, y)
    out = jax.block_until_ready(out)

    ref = _reference(mu, L, y)
    assert out.shape == (1, 1), out.shape
    assert jnp.allclose(out, ref, rtol=1e-3, atol=1e-2), (out, ref)

    print("KERNEL_OK")
</pallas_src>

<mosaic_0001>
module attributes {stable_mosaic.version = 11 : i64} {
  func.func @_lml_kernel(%arg0: i32, %arg1: memref<8x1xf32, #tpu.memory_space<vmem>>, %arg2: memref<8x1xf32, #tpu.memory_space<vmem>>, %arg3: memref<8x64xf32, #tpu.memory_space<vmem>>, %arg4: memref<1x1xf32, #tpu.memory_space<vmem>>, %arg5: memref<1x64xf32, #tpu.memory_space<vmem>>, %arg6: memref<1x1xf32, #tpu.memory_space<vmem>>) attributes {dimension_semantics = [#tpu.dimension_semantics<arbitrary>], iteration_bounds = array<i64: 8>, scalar_prefetch = 0 : i64, scratch_operands = 2 : i64, tpu.core_type = #tpu.core_type<tc>, window_params = [{transform_indices = @transform_0, window_bounds = array<i64: 8, 1>}, {transform_indices = @transform_1, window_bounds = array<i64: 8, 1>}, {transform_indices = @transform_2, window_bounds = array<i64: 8, 64>}, {pipeline_mode = #tpu.pipeline_mode<synchronous>, transform_indices = @transform_3, window_bounds = array<i64: 1, 1>}]} {
    %c8_i32 = arith.constant 8 : i32
    %0 = arith.muli %arg0, %c8_i32 : i32
    %c0_i32 = arith.constant 0 : i32
    %1 = arith.cmpi eq, %arg0, %c0_i32 : i32
    %2 = arith.extui %1 : i1 to i32
    %c0_i32_0 = arith.constant 0 : i32
    %3 = arith.cmpi ne, %2, %c0_i32_0 : i32
    scf.if %3 {
      %cst_38 = arith.constant 0.000000e+00 : f32
      %191 = vector.broadcast %cst_38 : f32 to vector<1x64xf32>
      %c0_39 = arith.constant 0 : index
      %c0_40 = arith.constant 0 : index
      %192 = vector.load %arg5[%c0_39, %c0_40] : memref<1x64xf32, #tpu.memory_space<vmem>>, vector<1x64xf32>
      tpu.vector_store %arg5[%c0_39, %c0_40], %191 {strides = array<i32>} : memref<1x64xf32, #tpu.memory_space<vmem>>, vector<1x64xf32>,
      %cst_41 = arith.constant 0.000000e+00 : f32
      %193 = vector.broadcast %cst_41 : f32 to vector<1x1xf32>
      %c0_42 = arith.constant 0 : index
      %c0_43 = arith.constant 0 : index
      %194 = vector.load %arg6[%c0_42, %c0_43] : memref<1x1xf32, #tpu.memory_space<vmem>>, vector<1x1xf32>
      tpu.vector_store %arg6[%c0_42, %c0_43], %193 {strides = array<i32>} : memref<1x1xf32, #tpu.memory_space<vmem>>, vector<1x1xf32>,
    } else {
    }
    %c0 = arith.constant 0 : index
    %c0_1 = arith.constant 0 : index
    %4 = vector.load %arg3[%c0, %c0_1] : memref<8x64xf32, #tpu.memory_space<vmem>>, vector<8x64xf32>
    %5 = tpu.iota {dimensions = array<i32: 0>} : vector<8x64xi32>
    %6 = tpu.iota {dimensions = array<i32: 1>} : vector<8x64xi32>
    %7 = vector.broadcast %0 : i32 to vector<8x64xi32>
    %8 = arith.addi %7, %5 : vector<8x64xi32>
    %9 = arith.cmpi sle, %6, %8 : vector<8x64xi32>
    %cst = arith.constant 0.000000e+00 : f32
    %10 = vector.broadcast %cst : f32 to vector<8x64xf32>
    %11 = arith.select %9, %4, %10 : vector<8x64xi1>, vector<8x64xf32>
    %c0_2 = arith.constant 0 : index
    %c0_3 = arith.constant 0 : index
    %12 = vector.load %arg5[%c0_2, %c0_3] : memref<1x64xf32, #tpu.memory_space<vmem>>, vector<1x64xf32>
    %13 = vector.broadcast %12 : vector<1x64xf32> to vector<8x64xf32>
    %14 = arith.mulf %11, %13 : vector<8x64xf32>
    %cst_4 = arith.constant dense<0.000000e+00> : vector<8xf32>
    %15 = vector.multi_reduction <add>, %14, %cst_4 [1] : vector<8x64xf32> to vector<8xf32>
    %16 = vector.shape_cast %15 : vector<8xf32> to vector<8x1xf32>
    %17 = tpu.iota {dimensions = array<i32: 0>} : vector<64x8xi32>
    %18 = tpu.iota {dimensions = array<i32: 1>} : vector<64x8xi32>
    %19 = vector.broadcast %0 : i32 to vector<64x8xi32>
    %20 = arith.addi %19, %18 : vector<64x8xi32>
    %21 = arith.cmpi eq, %17, %20 : vector<64x8xi32>
    %22 = arith.extui %21 : vector<64x8xi1> to vector<64x8xi32>
    %23 = arith.sitofp %22 : vector<64x8xi32> to vector<64x8xf32>
    %cst_5 = arith.constant dense<0.000000e+00> : vector<8x8xf32>
    %24 = tpu.matmul %11, %23, %cst_5 {dimension_numbers = #tpu.dot_dimension_numbers<[1], [0], [0], [1], [0, 0, 1, 1], [], []>} : vector<8x64xf32>, vector<64x8xf32>, vector<8x8xf32> -> vector<8x8xf32>
    %25 = tpu.iota {dimensions = array<i32: 0>} : vector<8x8xi32>
    %26 = tpu.iota {dimensions = array<i32: 1>} : vector<8x8xi32>
    %27 = arith.cmpi eq, %25, %26 : vector<8x8xi32>
    %cst_6 = arith.constant 0.000000e+00 : f32
    %28 = vector.broadcast %cst_6 : f32 to vector<8x8xf32>
    %29 = arith.select %27, %24, %28 : vector<8x8xi1>, vector<8x8xf32>
    %cst_7 = arith.constant dense<0.000000e+00> : vector<8xf32>
    %30 = vector.multi_reduction <add>, %29, %cst_7 [1] : vector<8x8xf32> to vector<8xf32>
    %31 = vector.shape_cast %30 : vector<8xf32> to vector<8x1xf32>
    %c0_8 = arith.constant 0 : index
    %c0_9 = arith.constant 0 : index
    %32 = vector.load %arg6[%c0_8, %c0_9] : memref<1x1xf32, #tpu.memory_space<vmem>>, vector<1x1xf32>
    %33 = math.log %31 : vector<8x1xf32>
    %34 = vector.shape_cast %33 : vector<8x1xf32> to vector<1x8x1xf32>
    %cst_10 = arith.constant dense<0.000000e+00> : vector<1xf32>
    %35 = vector.multi_reduction <add>, %34, %cst_10 [1, 2] : vector<1x8x1xf32> to vector<1xf32>
    %36 = vector.shape_cast %35 : vector<1xf32> to vector<1x1x1xf32>
    %37 = vector.extract %36[0, 0, 0] : f32 from vector<1x1x1xf32>
    %38 = vector.broadcast %37 : f32 to vector<1x1xf32>
    %39 = arith.addf %32, %38 : vector<1x1xf32>
    %c0_11 = arith.constant 0 : index
    %c0_12 = arith.constant 0 : index
    %40 = vector.load %arg6[%c0_11, %c0_12] : memref<1x1xf32, #tpu.memory_space<vmem>>, vector<1x1xf32>
    tpu.vector_store %arg6[%c0_11, %c0_12], %39 {strides = array<i32>} : memref<1x1xf32, #tpu.memory_space<vmem>>, vector<1x1xf32>,
    %cst_13 = arith.constant 1.000000e+00 : f32
    %41 = vector.broadcast %cst_13 : f32 to vector<8x1xf32>
    %42 = arith.divf %41, %31 : vector<8x1xf32>
    %c0_14 = arith.constant 0 : index
    %c0_15 = arith.constant 0 : index
    %43 = vector.load %arg2[%c0_14, %c0_15] : memref<8x1xf32, #tpu.memory_space<vmem>>, vector<8x1xf32>
    %c0_16 = arith.constant 0 : index
    %c0_17 = arith.constant 0 : index
    %44 = vector.load %arg1[%c0_16, %c0_17] : memref<8x1xf32, #tpu.memory_space<vmem>>, vector<8x1xf32>
    %45 = arith.subf %43, %44 : vector<8x1xf32>
    %46 = arith.subf %45, %16 : vector<8x1xf32>
    %47 = tpu.iota {dimensions = array<i32: 0>} : vector<8x1xi32>
    %48 = tpu.iota {dimensions = array<i32: 1>} : vector<1x64xi32>
    %cst_18 = arith.constant 0.000000e+00 : f32
    %49 = vector.broadcast %cst_18 : f32 to vector<1x64xf32>
    %50 = vector.extract_strided_slice %46 {offsets = [0, 0], sizes = [1, 1], strides = [1, 1]} : vector<8x1xf32> to vector<1x1xf32>
    %51 = vector.extract %50[0, 0] : f32 from vector<1x1xf32>
    %52 = vector.extract_strided_slice %42 {offsets = [0, 0], sizes = [1, 1], strides = [1, 1]} : vector<8x1xf32> to vector<1x1xf32>
    %53 = vector.extract %52[0, 0] : f32 from vector<1x1xf32>
    %54 = arith.mulf %51, %53 : f32
    %55 = vector.extract_strided_slice %24 {offsets = [0, 0], sizes = [8, 1], strides = [1, 1]} : vector<8x8xf32> to vector<8x1xf32>
    %c0_i32_19 = arith.constant 0 : i32
    %56 = vector.broadcast %c0_i32_19 : i32 to vector<8x1xi32>
    %57 = arith.cmpi sgt, %47, %56 : vector<8x1xi32>
    %cst_20 = arith.constant 0.000000e+00 : f32
    %58 = vector.broadcast %cst_20 : f32 to vector<8x1xf32>
    %59 = arith.select %57, %55, %58 : vector<8x1xi1>, vector<8x1xf32>
    %60 = vector.broadcast %54 : f32 to vector<8x1xf32>
    %61 = arith.mulf %59, %60 : vector<8x1xf32>
    %62 = arith.subf %46, %61 : vector<8x1xf32>
    %c0_i32_21 = arith.constant 0 : i32
    %63 = arith.addi %0, %c0_i32_21 : i32
    %64 = vector.broadcast %63 : i32 to vector<1x64xi32>
    %65 = arith.cmpi eq, %48, %64 : vector<1x64xi32>
    %66 = vector.broadcast %54 : f32 to vector<1x64xf32>
    %67 = arith.select %65, %66, %49 : vector<1x64xi1>, vector<1x64xf32>
    %68 = vector.extract_strided_slice %62 {offsets = [1, 0], sizes = [1, 1], strides = [1, 1]} : vector<8x1xf32> to vector<1x1xf32>
    %69 = vector.extract %68[0, 0] : f32 from vector<1x1xf32>
    %70 = vector.extract_strided_slice %42 {offsets = [1, 0], sizes = [1, 1], strides = [1, 1]} : vector<8x1xf32> to vector<1x1xf32>
    %71 = vector.extract %70[0, 0] : f32 from vector<1x1xf32>
    %72 = arith.mulf %69, %71 : f32
    %73 = vector.extract_strided_slice %24 {offsets = [0, 1], sizes = [8, 1], strides = [1, 1]} : vector<8x8xf32> to vector<8x1xf32>
    %c1_i32 = arith.constant 1 : i32
    %74 = vector.broadcast %c1_i32 : i32 to vector<8x1xi32>
    %75 = arith.cmpi sgt, %47, %74 : vector<8x1xi32>
    %cst_22 = arith.constant 0.000000e+00 : f32
    %76 = vector.broadcast %cst_22 : f32 to vector<8x1xf32>
    %77 = arith.select %75, %73, %76 : vector<8x1xi1>, vector<8x1xf32>
    %78 = vector.broadcast %72 : f32 to vector<8x1xf32>
    %79 = arith.mulf %77, %78 : vector<8x1xf32>
    %80 = arith.subf %62, %79 : vector<8x1xf32>
    %c1_i32_23 = arith.constant 1 : i32
    %81 = arith.addi %0, %c1_i32_23 : i32
    %82 = vector.broadcast %81 : i32 to vector<1x64xi32>
    %83 = arith.cmpi eq, %48, %82 : vector<1x64xi32>
    %84 = vector.broadcast %72 : f32 to vector<1x64xf32>
    %85 = arith.select %83, %84, %67 : vector<1x64xi1>, vector<1x64xf32>
    %86 = vector.extract_strided_slice %80 {offsets = [2, 0], sizes = [1, 1], strides = [1, 1]} : vector<8x1xf32> to vector<1x1xf32>
    %87 = vector.extract %86[0, 0] : f32 from vector<1x1xf32>
    %88 = vector.extract_strided_slice %42 {offsets = [2, 0], sizes = [1, 1], strides = [1, 1]} : vector<8x1xf32> to vector<1x1xf32>
    %89 = vector.extract %88[0, 0] : f32 from vector<1x1xf32>
    %90 = arith.mulf %87, %89 : f32
    %91 = vector.extract_strided_slice %24 {offsets = [0, 2], sizes = [8, 1], strides = [1, 1]} : vector<8x8xf32> to vector<8x1xf32>
    %c2_i32 = arith.constant 2 : i32
    %92 = vector.broadcast %c2_i32 : i32 to vector<8x1xi32>
    %93 = arith.cmpi sgt, %47, %92 : vector<8x1xi32>
    %cst_24 = arith.constant 0.000000e+00 : f32
    %94 = vector.broadcast %cst_24 : f32 to vector<8x1xf32>
    %95 = arith.select %93, %91, %94 : vector<8x1xi1>, vector<8x1xf32>
    %96 = vector.broadcast %90 : f32 to vector<8x1xf32>
    %97 = arith.mulf %95, %96 : vector<8x1xf32>
    %98 = arith.subf %80, %97 : vector<8x1xf32>
    %c2_i32_25 = arith.constant 2 : i32
    %99 = arith.addi %0, %c2_i32_25 : i32
    %100 = vector.broadcast %99 : i32 to vector<1x64xi32>
    %101 = arith.cmpi eq, %48, %100 : vector<1x64xi32>
    %102 = vector.broadcast %90 : f32 to vector<1x64xf32>
    %103 = arith.select %101, %102, %85 : vector<1x64xi1>, vector<1x64xf32>
    %104 = vector.extract_strided_slice %98 {offsets = [3, 0], sizes = [1, 1], strides = [1, 1]} : vector<8x1xf32> to vector<1x1xf32>
    %105 = vector.extract %104[0, 0] : f32 from vector<1x1xf32>
    %106 = vector.extract_strided_slice %42 {offsets = [3, 0], sizes = [1, 1], strides = [1, 1]} : vector<8x1xf32> to vector<1x1xf32>
    %107 = vector.extract %106[0, 0] : f32 from vector<1x1xf32>
    %108 = arith.mulf %105, %107 : f32
    %109 = vector.extract_strided_slice %24 {offsets = [0, 3], sizes = [8, 1], strides = [1, 1]} : vector<8x8xf32> to vector<8x1xf32>
    %c3_i32 = arith.constant 3 : i32
    %110 = vector.broadcast %c3_i32 : i32 to vector<8x1xi32>
    %111 = arith.cmpi sgt, %47, %110 : vector<8x1xi32>
    %cst_26 = arith.constant 0.000000e+00 : f32
    %112 = vector.broadcast %cst_26 : f32 to vector<8x1xf32>
    %113 = arith.select %111, %109, %112 : vector<8x1xi1>, vector<8x1xf32>
    %114 = vector.broadcast %108 : f32 to vector<8x1xf32>
    %115 = arith.mulf %113, %114 : vector<8x1xf32>
    %116 = arith.subf %98, %115 : vector<8x1xf32>
    %c3_i32_27 = arith.constant 3 : i32
    %117 = arith.addi %0, %c3_i32_27 : i32
    %118 = vector.broadcast %117 : i32 to vector<1x64xi32>
    %119 = arith.cmpi eq, %48, %118 : vector<1x64xi32>
    %120 = vector.broadcast %108 : f32 to vector<1x64xf32>
    %121 = arith.select %119, %120, %103 : vector<1x64xi1>, vector<1x64xf32>
    %122 = vector.extract_strided_slice %116 {offsets = [4, 0], sizes = [1, 1], strides = [1, 1]} : vector<8x1xf32> to vector<1x1xf32>
    %123 = vector.extract %122[0, 0] : f32 from vector<1x1xf32>
    %124 = vector.extract_strided_slice %42 {offsets = [4, 0], sizes = [1, 1], strides = [1, 1]} : vector<8x1xf32> to vector<1x1xf32>
    %125 = vector.extract %124[0, 0] : f32 from vector<1x1xf32>
    %126 = arith.mulf %123, %125 : f32
    %127 = vector.extract_strided_slice %24 {offsets = [0, 4], sizes = [8, 1], strides = [1, 1]} : vector<8x8xf32> to vector<8x1xf32>
    %c4_i32 = arith.constant 4 : i32
    %128 = vector.broadcast %c4_i32 : i32 to vector<8x1xi32>
    %129 = arith.cmpi sgt, %47, %128 : vector<8x1xi32>
    %cst_28 = arith.constant 0.000000e+00 : f32
    %130 = vector.broadcast %cst_28 : f32 to vector<8x1xf32>
    %131 = arith.select %129, %127, %130 : vector<8x1xi1>, vector<8x1xf32>
    %132 = vector.broadcast %126 : f32 to vector<8x1xf32>
    %133 = arith.mulf %131, %132 : vector<8x1xf32>
    %134 = arith.subf %116, %133 : vector<8x1xf32>
    %c4_i32_29 = arith.constant 4 : i32
    %135 = arith.addi %0, %c4_i32_29 : i32
    %136 = vector.broadcast %135 : i32 to vector<1x64xi32>
    %137 = arith.cmpi eq, %48, %136 : vector<1x64xi32>
    %138 = vector.broadcast %126 : f32 to vector<1x64xf32>
    %139 = arith.select %137, %138, %121 : vector<1x64xi1>, vector<1x64xf32>
    %140 = vector.extract_strided_slice %134 {offsets = [5, 0], sizes = [1, 1], strides = [1, 1]} : vector<8x1xf32> to vector<1x1xf32>
    %141 = vector.extract %140[0, 0] : f32 from vector<1x1xf32>
    %142 = vector.extract_strided_slice %42 {offsets = [5, 0], sizes = [1, 1], strides = [1, 1]} : vector<8x1xf32> to vector<1x1xf32>
    %143 = vector.extract %142[0, 0] : f32 from vector<1x1xf32>
    %144 = arith.mulf %141, %143 : f32
    %145 = vector.extract_strided_slice %24 {offsets = [0, 5], sizes = [8, 1], strides = [1, 1]} : vector<8x8xf32> to vector<8x1xf32>
    %c5_i32 = arith.constant 5 : i32
    %146 = vector.broadcast %c5_i32 : i32 to vector<8x1xi32>
    %147 = arith.cmpi sgt, %47, %146 : vector<8x1xi32>
    %cst_30 = arith.constant 0.000000e+00 : f32
    %148 = vector.broadcast %cst_30 : f32 to vector<8x1xf32>
    %149 = arith.select %147, %145, %148 : vector<8x1xi1>, vector<8x1xf32>
    %150 = vector.broadcast %144 : f32 to vector<8x1xf32>
    %151 = arith.mulf %149, %150 : vector<8x1xf32>
    %152 = arith.subf %134, %151 : vector<8x1xf32>
    %c5_i32_31 = arith.constant 5 : i32
    %153 = arith.addi %0, %c5_i32_31 : i32
    %154 = vector.broadcast %153 : i32 to vector<1x64xi32>
    %155 = arith.cmpi eq, %48, %154 : vector<1x64xi32>
    %156 = vector.broadcast %144 : f32 to vector<1x64xf32>
    %157 = arith.select %155, %156, %139 : vector<1x64xi1>, vector<1x64xf32>
    %158 = vector.extract_strided_slice %152 {offsets = [6, 0], sizes = [1, 1], strides = [1, 1]} : vector<8x1xf32> to vector<1x1xf32>
    %159 = vector.extract %158[0, 0] : f32 from vector<1x1xf32>
    %160 = vector.extract_strided_slice %42 {offsets = [6, 0], sizes = [1, 1], strides = [1, 1]} : vector<8x1xf32> to vector<1x1xf32>
    %161 = vector.extract %160[0, 0] : f32 from vector<1x1xf32>
    %162 = arith.mulf %159, %161 : f32
    %163 = vector.extract_strided_slice %24 {offsets = [0, 6], sizes = [8, 1], strides = [1, 1]} : vector<8x8xf32> to vector<8x1xf32>
    %c6_i32 = arith.constant 6 : i32
    %164 = vector.broadcast %c6_i32 : i32 to vector<8x1xi32>
    %165 = arith.cmpi sgt, %47, %164 : vector<8x1xi32>
    %cst_32 = arith.constant 0.000000e+00 : f32
    %166 = vector.broadcast %cst_32 : f32 to vector<8x1xf32>
    %167 = arith.select %165, %163, %166 : vector<8x1xi1>, vector<8x1xf32>
    %168 = vector.broadcast %162 : f32 to vector<8x1xf32>
    %169 = arith.mulf %167, %168 : vector<8x1xf32>
    %170 = arith.subf %152, %169 : vector<8x1xf32>
    %c6_i32_33 = arith.constant 6 : i32
    %171 = arith.addi %0, %c6_i32_33 : i32
    %172 = vector.broadcast %171 : i32 to vector<1x64xi32>
    %173 = arith.cmpi eq, %48, %172 : vector<1x64xi32>
    %174 = vector.broadcast %162 : f32 to vector<1x64xf32>
    %175 = arith.select %173, %174, %157 : vector<1x64xi1>, vector<1x64xf32>
    %176 = vector.extract_strided_slice %170 {offsets = [7, 0], sizes = [1, 1], strides = [1, 1]} : vector<8x1xf32> to vector<1x1xf32>
    %177 = vector.extract %176[0, 0] : f32 from vector<1x1xf32>
    %178 = vector.extract_strided_slice %42 {offsets = [7, 0], sizes = [1, 1], strides = [1, 1]} : vector<8x1xf32> to vector<1x1xf32>
    %179 = vector.extract %178[0, 0] : f32 from vector<1x1xf32>
    %180 = arith.mulf %177, %179 : f32
    %c7_i32 = arith.constant 7 : i32
    %181 = arith.addi %0, %c7_i32 : i32
    %182 = vector.broadcast %181 : i32 to vector<1x64xi32>
    %183 = arith.cmpi eq, %48, %182 : vector<1x64xi32>
    %184 = vector.broadcast %180 : f32 to vector<1x64xf32>
    %185 = arith.select %183, %184, %175 : vector<1x64xi1>, vector<1x64xf32>
    %186 = arith.addf %12, %185 : vector<1x64xf32>
    %c0_34 = arith.constant 0 : index
    %c0_35 = arith.constant 0 : index
    %187 = vector.load %arg5[%c0_34, %c0_35] : memref<1x64xf32, #tpu.memory_space<vmem>>, vector<1x64xf32>
    tpu.vector_store %arg5[%c0_34, %c0_35], %186 {strides = array<i32>} : memref<1x64xf32, #tpu.memory_space<vmem>>, vector<1x64xf32>,
    %c7_i32_36 = arith.constant 7 : i32
    %188 = arith.cmpi eq, %arg0, %c7_i32_36 : i32
    %189 = arith.extui %188 : i1 to i32
    %c0_i32_37 = arith.constant 0 : i32
    %190 = arith.cmpi ne, %189, %c0_i32_37 : i32
    scf.if %190 {
      %c0_38 = arith.constant 0 : index
      %c0_39 = arith.constant 0 : index
      %191 = vector.load %arg5[%c0_38, %c0_39] : memref<1x64xf32, #tpu.memory_space<vmem>>, vector<1x64xf32>
      %192 = arith.mulf %191, %191 : vector<1x64xf32>
      %193 = vector.shape_cast %192 : vector<1x64xf32> to vector<1x1x64xf32>
      %cst_40 = arith.constant dense<0.000000e+00> : vector<1xf32>
      %194 = vector.multi_reduction <add>, %193, %cst_40 [1, 2] : vector<1x1x64xf32> to vector<1xf32>
      %195 = vector.shape_cast %194 : vector<1xf32> to vector<1x1x1xf32>
      %196 = vector.extract %195[0, 0, 0] : f32 from vector<1x1x1xf32>
      %cst_41 = arith.constant -5.000000e-01 : f32
      %197 = arith.mulf %cst_41, %196 : f32
      %cst_42 = arith.constant 58.8120651 : f32
      %198 = arith.subf %197, %cst_42 : f32
      %199 = vector.broadcast %198 : f32 to vector<1x1xf32>
      %c0_43 = arith.constant 0 : index
      %c0_44 = arith.constant 0 : index
      %200 = vector.load %arg6[%c0_43, %c0_44] : memref<1x1xf32, #tpu.memory_space<vmem>>, vector<1x1xf32>
      %201 = arith.subf %199, %200 : vector<1x1xf32>
      %c0_45 = arith.constant 0 : index
      %c0_46 = arith.constant 0 : index
      %202 = vector.load %arg4[%c0_45, %c0_46] : memref<1x1xf32, #tpu.memory_space<vmem>>, vector<1x1xf32>
      tpu.vector_store %arg4[%c0_45, %c0_46], %201 {strides = array<i32>} : memref<1x1xf32, #tpu.memory_space<vmem>>, vector<1x1xf32>,
    } else {
    }
    return
  }
  func.func @transform_0(%arg0: i32) -> (i32, i32) {
    %c0_i32 = arith.constant 0 : i32
    %c0_i32_0 = arith.constant 0 : i32
    return %arg0, %c0_i32 : i32, i32
  }
  func.func @transform_1(%arg0: i32) -> (i32, i32) {
    %c0_i32 = arith.constant 0 : i32
    %c0_i32_0 = arith.constant 0 : i32
    return %arg0, %c0_i32 : i32, i32
  }
  func.func @transform_2(%arg0: i32) -> (i32, i32) {
    %c0_i32 = arith.constant 0 : i32
    %c0_i32_0 = arith.constant 0 : i32
    return %arg0, %c0_i32 : i32, i32
  }
  func.func @transform_3(%arg0: i32) -> (i32, i32) {
    %c0_i32 = arith.constant 0 : i32
    %c0_i32_0 = arith.constant 0 : i32
    %c0_i32_1 = arith.constant 0 : i32
    return %c0_i32, %c0_i32_0 : i32, i32
  }
}

</mosaic_0001>

<bundles_post_ra>
// kernel: tpu_custom_call.1
= control target key start
LH: loop header
LB: loop body
LE: loop exit
PB: predicated region body
PF: predicated region fallthrough
CT: control target
= control target key end

     0   :  { %8 = vsyncpa [#allocation5], 0  ;;  %s703_s12 = smov 0   ;;  %s823_s0 = inlined_call_operand.vmem [shape: f32[64,1], index: 0, kind: input, shape index: {}]   ;;  %s824_s1 = inlined_call_operand.vmem [shape: f32[64,1], index: 1, kind: input, shape index: {}]   ;;  %s825_s2 = inlined_call_operand.vmem [shape: f32[64,64], index: 2, kind: input, shape index: {}]   ;;  %s826_s3 = inlined_call_operand.hbm [shape: f32[1,1], index: 3, kind: output, shape index: {}]  }
   0x1 LB: > { %s709_s13 = sadd.s32 4294967295, %s672_s12   ;;  %p541_p0 = scmp.ge.s32.totalorder %s672_s12, 1  ;;  %s672_s12 = sphi %s703_s12, %s14_s12  }
   0x2   : > { %p150_p1 = scmp.lt.s32.totalorder %s672_s12, 9 }
   0x4   : > { %p151_p2 = pnand %p541_p0, %p150_p1 }
   0x5   : > { %p176_p3 = scmp.lt.s32.totalorder (!%p151_p2), %s709_s13, 7  ;;  %s715_s14 = sshll.u32 (!%p151_p2), %s709_s13, 3 }
   0x6   : > { %154 = sbr.rel (%p151_p2) target bundleno = 1698 (0x6a2), region = 32  ;;  %p546_p4 = scmp.ne.s32.totalorder (!%p151_p2), %s709_s13, 0 }
   0xb   : > { %s177_s15 = scalar_select %p176_p3, %s709_s13, 7 }
   0xc   : > { %192 = sbr.rel (%p546_p4) target bundleno = 20 (0x14), region = 36 }
   0xd   : > { %s718_s16 = sshll.u32 %s177_s15, 3 }
   0xe   : > { %s179_s19 = scalar_lea.vmem %s823_s0, %s718_s16  ;;  %s183_s22 = scalar_lea.vmem %s824_s1, %s718_s16 }
   0xf   : > { %s187_s25 = scalar_lea.vmem %s825_s2, %s718_s16 }
  0x11   : > { %vm193_vm0 = vcmask 516096   ;;  %vm195_vm1 = vcmask 0   ;;  %v674_v0 = vmov 0.0  }
  0x12   : > { %194 = vst.msk [vmem:[#allocation2] sm:$0x1] %vm193_vm0, %v674_v0 }
  0x13   : > { %196 = vst.msk [vmem:[#allocation3] sm:$0x1] %vm195_vm1, %v674_v0 }
  0x14 PF: > { %v198_v1 = vlaneseq  ;;  %v734_v2 = vstv %s715_s14  ;;  %v675_v10 = vmov 1.0   ;;  %v197_v15 = vld [vmem:[%s187_s25] sm:$0xff]  ;;  %vm211_vm11 = vcmask 523264   ;;  %s337_s9 = sadd.s32 1, %s715_s14  ;;  %s676_s16 = smov 127  }
  0x15   : > { %vm272_vm13 = vcmask 64512   ;;  %vm279_vm14 = vcmask 7168   ;;  %v309_v34 = vld [vmem:[%s183_s22] sm:$0xff]  ;;  %v338_v58 = vstv %s337_s9  ;;  %s355_s17 = sadd.s32 2, %s715_s14  ;;  %s677_s21 = smov 126  }
  0x16   : > { %v736_v3 = vshrl.u32 %v198_v1, 7  ;;  %v738_v4 = vand.u32 127, %v198_v1  ;;  %v310_v35 = vld [vmem:[%s179_s19] sm:$0xff]  ;;  %s373_s22 = sadd.s32 3, %s715_s14  ;;  %s678_s26 = smov 125  }
  0x17   : > { %v311_v37 = vsub.f32 %v309_v34, %v310_v35  ;;  %s391_s27 = sadd.s32 4, %s715_s14  ;;  %s679_s4 = smov 124  }
  0x18   : > { %v221_v5 = vadd.s32 56, %v736_v3  ;;  %v222_v6 = vadd.s32 %v734_v2, %v738_v4  ;;  %v220_v7 = vadd.s32 48, %v736_v3  ;;  %v219_v8 = vadd.s32 40, %v736_v3  ;;  %s680_s9 = smov 123   ;;  %p564_p5 = scmp.ne.s32.totalorder %s709_s13, 7 }
  0x19   : > { %v218_v9 = vadd.s32 32, %v736_v3  ;;  %v217_v11 = vadd.s32 24, %v736_v3  ;;  %v216_v12 = vadd.s32 16, %v736_v3  ;;  %v215_v13 = vadd.s32 8, %v736_v3  ;;  %v629_v20 = vld [vmem:[#allocation2] ss:$0 sm:$0xff] }
  0x1a   : > { %vm230_vm2 = vcmp.eq.s32.totalorder %v221_v5, %v222_v6  ;;  %vm229_vm3 = vcmp.eq.s32.totalorder %v220_v7, %v222_v6  ;;  %vm228_vm4 = vcmp.eq.s32.totalorder %v219_v8, %v222_v6  ;;  %v203_v14 = vadd.s32 %v734_v2, %v736_v3  ;;  %v276_v49 = vld [vmem:[#allocation3] sm:$0x1] }
  0x1b   : > { %555 = vmatpush.msk.msra.mxu0 %vm230_vm2, %v675_v10  ;;  %vm227_vm5 = vcmp.eq.s32.totalorder %v218_v9, %v222_v6  ;;  %vm226_vm6 = vcmp.eq.s32.totalorder %v217_v11, %v222_v6  ;;  %vm225_vm7 = vcmp.eq.s32.totalorder %v216_v12, %v222_v6  ;;  %vm224_vm8 = vcmp.eq.s32.totalorder %v215_v13, %v222_v6 }
  0x1c   : > { %vm204_vm9 = vcmp.le.s32.totalorder %v738_v4, %v203_v14  ;;  %vm223_vm10 = vcmp.eq.s32.totalorder %v736_v3, %v222_v6  ;;  %vm270_vm12 = vcmp.eq.s32.totalorder %v736_v3, %v738_v4  ;;  %v356_v6 = vstv %s355_s17  ;;  %s681_s17 = smov 122  }
  0x1d   : > { %556 = vmatpush.msk.msra.mxu0 %vm229_vm3, %v675_v10  ;;  %v205_v16 = vsel %vm204_vm9, %v197_v15, 0.0  ;;  %vm292_vm3 = vcmask 0   ;;  %vm357_vm9 = vcmp.eq.s32.totalorder %v738_v4, %v356_v6  ;;  %v374_v15 = vstv %s373_s22 }
  0x1e   : > { %v210_v21 = vmul.f32 %v629_v20, %v205_v16 }
  0x1f   : > { %557 = vmatpush.msk.msra.mxu0 %vm228_vm4, %v675_v10  ;;  %vm316_vm4 = vcmp.gt.s32.totalorder %v736_v3, 0 }
  0x20   : > { %v212_v22 = vsel %vm211_vm11, %v210_v21, 0.0 }
  0x21   : > { %558 = vmatpush.msk.msra.mxu0 %vm227_vm5, %v675_v10  ;;  %213 = vadd.xlane.f32.xlu1 %v212_v22  ;;  %vm321_vm5 = vcmp.eq.s32.totalorder %v738_v4, %v734_v2 }
  0x23   : > { %559 = vmatpush.msk.msra.mxu0 %vm226_vm6, %v675_v10  ;;  %vm328_vm6 = vcmp.gt.s32.totalorder %v736_v3, 1 }
  0x25   : > { %560 = vmatpush.msk.msra.mxu0 %vm225_vm7, %v675_v10  ;;  %vm339_vm7 = vcmp.eq.s32.totalorder %v738_v4, %v338_v58 }
  0x27   : > { %561 = vmatpush.msk.msra.mxu0 %vm224_vm8, %v675_v10  ;;  %vm346_vm8 = vcmp.gt.s32.totalorder %v736_v3, 2 }
  0x29   : > { %562 = vmatpush.msk.msra.mxu0 %vm223_vm10, %v675_v10  ;;  %vm364_vm10 = vcmp.gt.s32.totalorder %v736_v3, 3 }
  0x2a   : > { %563 = vmatmul.msk.f32.vlgmr.msra.gmra.mxu0 %vm211_vm11, %v205_v16  ;;  %vm375_vm11 = vcmp.eq.s32.totalorder %v738_v4, %v374_v15 }
  0x94   : > { %v214_v39 = vpop.xlane.xlu1 %213 }
  0x95   : > { %v312_v44 = vsub.f32 %v311_v37, %v214_v39 }
  0xa7   : > { %v760_v17 = vpop.f32.mrf.mxu0 }
  0xa8   : > { %v271_v18 = vsel %vm270_vm12, %v760_v17, 0.0  ;;  %v317_v52 = vsel %vm316_vm4, %v760_v17, 0.0  ;;  %v329_v60 = vsel %vm328_vm6, %v760_v17, 0.0  ;;  %v347_v8 = vsel %vm346_vm8, %v760_v17, 0.0 }
  0xa9   : > { %v273_v19 = vsel %vm272_vm13, %v271_v18, 0.0  ;;  %v365_v16 = vsel %vm364_vm10, %v760_v17, 0.0  ;;  %vm382_vm12 = vcmp.gt.s32.totalorder %v736_v3, 4  ;;  %vm442_vm4 = vcmask 516096  }
  0xaa   : > { %274 = vadd.xlane.f32.xlu0 %v273_v19 }
 0x11d   : > { %v275_v23 = vpop.xlane.xlu0 %274 }
 0x11e   : > { %630 = vlog2.f32 %v275_v23  ;;  %v305_v41 = vand.u32 2147483648, %v275_v23  ;;  %vm299_vm0 = vweird.f32 %v275_v23  ;;  %v303_v42 = vand.u32 2147483647, %v275_v23 }
 0x11f   : > { %632 = vrcp.f32 %v275_v23 }
 0x120   : > { %v306_v47 = vor.u32 1.1754944e-38, %v305_v41  ;;  %vm304_vm2 = vcmp.eq.f32.partialorder %v303_v42, 8.507059e+37 }
 0x124   : > { %v631_v24 = vpop.eup %630 }
 0x125   : > { %v278_v25 = vmul.f32 0.6931472, %v631_v24  ;;  %v633_v27 = vpop.eup %632 }
 0x126   : > { %v295_v28 = vmul.f32 %v633_v27, %v275_v23  ;;  %vm300_vm15 = vweird.f32 %v633_v27 }
 0x127   : > { %v280_v26 = vsel %vm279_vm14, %v278_v25, 0.0  ;;  %vm301_vm1 = vmor %vm299_vm0, %vm300_vm15  ;;  %v392_v25 = vstv %s391_s27  ;;  %vm400_vm14 = vcmp.gt.s32.totalorder %v736_v3, 5  ;;  %vm418_vm0 = vcmp.gt.s32.totalorder %v736_v3, 6  ;;  %v206_v3 = vld [vmem:[#allocation2] sm:$0x1] }
 0x128   : > { %281 = vadd.xlane.f32.xlu0 %v280_v26  ;;  %v296_v29 = vsub.f32 1.0, %v295_v28  ;;  %vm393_vm13 = vcmp.eq.s32.totalorder %v738_v4, %v392_v25  ;;  %v383_v26 = vsel %vm382_vm12, %v760_v17, 0.0  ;;  %v401_v35 = vsel %vm400_vm14, %v760_v17, 0.0 }
 0x12a   : > { %v297_v32 = vmul.f32 %v633_v27, %v296_v29 }
 0x12c   : > { %v298_v38 = vadd.f32 %v633_v27, %v297_v32 }
 0x12e   : > { %v302_v45 = vsel %vm301_vm1, %v633_v27, %v298_v38 }
 0x12f   : > { %v773_v48 = vsel %vm304_vm2, %v306_v47, %v302_v45 }
 0x130   : > { %v325_v57 = vrot.slane %v773_v48, 1  ;;  %v343_v2 = vrot.slane %v773_v48, 2  ;;  %v361_v14 = vrot.slane %v773_v48, 3  ;;  %v379_v24 = vrot.slane %v773_v48, 4 }
 0x131   : > { %v415_v42 = vrot.slane %v773_v48, 6 }
 0x19b   : > { %v282_v30 = vpop.xlane.xlu0 %281 }
 0x19c   : > { %v283_v31 = vrot.slane %v282_v30, 4 }
 0x19e   : > { %v284_v33 = vadd.f32 %v283_v31, %v282_v30 }
 0x1a0   : > { %v285_v36 = vrot.slane %v284_v33, 2 }
 0x1a2   : > { %v286_v40 = vadd.f32 %v285_v36, %v284_v33  ;;  %v397_v33 = vrot.slane %v773_v48, 5 }
 0x1a4   : > { %v287_v43 = vrot.slane %v286_v40, 1 }
 0x1a6   : > { %v288_v46 = vadd.f32 %v287_v43, %v286_v40 }
 0x1a8   : > { %570 = vpush %v288_v46 }
 0x1a9   : > { %572 = vpush %v312_v44 }
 0x1aa   : > { %574 = vpush %v773_v48 }
 0x1d9   : > { %s571_s5 = spop %570 }
 0x1da   : > { %v290_v50 = vstv %s571_s5  ;;  %s573_s6 = spop %572  ;;  %s409_s5 = sadd.s32 5, %s715_s14 }
 0x1db   : > { %v291_v51 = vadd.f32 %v290_v50, %v276_v49  ;;  %s575_s7 = spop %574  ;;  %v410_v34 = vstv %s409_s5 }
 0x1dc   : > { %s315_s8 = smul.f32 %s575_s7, %s573_s6  ;;  %vm411_vm15 = vcmp.eq.s32.totalorder %v738_v4, %v410_v34 }
 0x1dd   : > { %293 = vst.msk [vmem:[#allocation3] sm:$0x1] %vm292_vm3, %v291_v51 }
 0x1de   : > { %v318_v53 = vstv %s315_s8 }
 0x1df   : > { %v319_v54 = vmul.f32 %v318_v53, %v317_v52  ;;  %v322_v59 = vsel %vm321_vm5, %v318_v53, 0.0  ;;  %v433_v52 = vrot.slane %v773_v48, 7 }
 0x1e1   : > { %v320_v55 = vsub.f32 %v312_v44, %v319_v54  ;;  %v419_v44 = vsel %vm418_vm0, %v760_v17, 0.0 }
 0x1e3   : > { %v323_v56 = vrot.slane %v320_v55, 1 }
 0x1e5   : > { %576 = vpush %v323_v56 }
 0x1e6   : > { %578 = vpush %v325_v57 }
 0x216   : > { %s577_s10 = spop %576 }
 0x217   : > { %s579_s11 = spop %578 }
 0x218   : > { %s327_s15 = smul.f32 %s579_s11, %s577_s10  ;;  %s427_s10 = sadd.s32 6, %s715_s14 }
 0x219   : > { %v428_v43 = vstv %s427_s10 }
 0x21a   : > { %v330_v61 = vstv %s327_s15  ;;  %vm429_vm1 = vcmp.eq.s32.totalorder %v738_v4, %v428_v43 }
 0x21b   : > { %v331_v62 = vmul.f32 %v330_v61, %v329_v60  ;;  %v340_v63 = vsel %vm339_vm7, %v330_v61, %v322_v59 }
 0x21d   : > { %333 = vrot.lane.b32.xlu1 %v331_v62, %s676_s16 }
 0x28f   : > { %v334_v0 = vpop.permute.xlu1 %333 }
 0x290   : > { %v336_v1 = vsub.f32 %v320_v55, %v334_v0 }
 0x292   : > { %v341_v5 = vrot.slane %v336_v1, 2 }
 0x294   : > { %580 = vpush %v341_v5 }
 0x295   : > { %582 = vpush %v343_v2 }
 0x2c5   : > { %s581_s18 = spop %580 }
 0x2c6   : > { %s583_s19 = spop %582 }
 0x2c7   : > { %s345_s20 = smul.f32 %s583_s19, %s581_s18  ;;  %s436_s18 = sadd.s32 7, %s715_s14 }
 0x2c8   : > { %v437_v53 = vstv %s436_s18 }
 0x2c9   : > { %v348_v7 = vstv %s345_s20  ;;  %vm438_vm2 = vcmp.eq.s32.totalorder %v738_v4, %v437_v53 }
 0x2ca   : > { %v358_v9 = vsel %vm357_vm9, %v348_v7, %v340_v63  ;;  %v349_v10 = vmul.f32 %v348_v7, %v347_v8 }
 0x2cc   : > { %351 = vrot.lane.b32.xlu2 %v349_v10, %s677_s21 }
 0x326   : > { %v352_v11 = vpop.permute.xlu2 %351 }
 0x327   : > { %v354_v12 = vsub.f32 %v336_v1, %v352_v11 }
 0x329   : > { %v359_v13 = vrot.slane %v354_v12, 3 }
 0x32b   : > { %584 = vpush %v359_v13 }
 0x32c   : > { %586 = vpush %v361_v14 }
 0x35c   : > { %s585_s23 = spop %584 }
 0x35d   : > { %s587_s24 = spop %586 }
 0x35e   : > { %s363_s25 = smul.f32 %s587_s24, %s585_s23 }
 0x360   : > { %v366_v18 = vstv %s363_s25 }
 0x361   : > { %v367_v19 = vmul.f32 %v366_v18, %v365_v16  ;;  %v376_v20 = vsel %vm375_vm11, %v366_v18, %v358_v9 }
 0x363   : > { %369 = vrot.lane.b32.xlu2 %v367_v19, %s678_s26 }
 0x3bd   : > { %v370_v21 = vpop.permute.xlu2 %369 }
 0x3be   : > { %v372_v22 = vsub.f32 %v354_v12, %v370_v21 }
 0x3c0   : > { %v377_v23 = vrot.slane %v372_v22, 4 }
 0x3c2   : > { %588 = vpush %v377_v23 }
 0x3c3   : > { %590 = vpush %v379_v24 }
 0x3f3   : > { %s589_s28 = spop %588 }
 0x3f4   : > { %s591_s29 = spop %590 }
 0x3f5   : > { %s381_s30 = smul.f32 %s591_s29, %s589_s28 }
 0x3f7   : > { %v384_v27 = vstv %s381_s30 }
 0x3f8   : > { %v385_v28 = vmul.f32 %v384_v27, %v383_v26  ;;  %v394_v29 = vsel %vm393_vm13, %v384_v27, %v376_v20 }
 0x3fa   : > { %387 = vrot.lane.b32.xlu0 %v385_v28, %s679_s4 }
 0x46c   : > { %v388_v30 = vpop.permute.xlu0 %387 }
 0x46d   : > { %v390_v31 = vsub.f32 %v372_v22, %v388_v30 }
 0x46f   : > { %v395_v32 = vrot.slane %v390_v31, 5 }
 0x471   : > { %592 = vpush %v395_v32 }
 0x472   : > { %594 = vpush %v397_v33 }
 0x4a2   : > { %s593_s6 = spop %592 }
 0x4a3   : > { %s595_s7 = spop %594 }
 0x4a4   : > { %s399_s8 = smul.f32 %s595_s7, %s593_s6 }
 0x4a6   : > { %v402_v36 = vstv %s399_s8 }
 0x4a7   : > { %v403_v37 = vmul.f32 %v402_v36, %v401_v35  ;;  %v412_v38 = vsel %vm411_vm15, %v402_v36, %v394_v29 }
 0x4a9   : > { %405 = vrot.lane.b32.xlu2 %v403_v37, %s680_s9 }
 0x503   : > { %v406_v39 = vpop.permute.xlu2 %405 }
 0x504   : > { %v408_v40 = vsub.f32 %v390_v31, %v406_v39 }
 0x506   : > { %v413_v41 = vrot.slane %v408_v40, 6 }
 0x508   : > { %596 = vpush %v413_v41 }
 0x509   : > { %598 = vpush %v415_v42 }
 0x539   : > { %s597_s11 = spop %596 }
 0x53a   : > { %s599_s15 = spop %598 }
 0x53b   : > { %s417_s16 = smul.f32 %s599_s15, %s597_s11 }
 0x53d   : > { %v420_v45 = vstv %s417_s16 }
 0x53e   : > { %v421_v46 = vmul.f32 %v420_v45, %v419_v44  ;;  %v430_v47 = vsel %vm429_vm1, %v420_v45, %v412_v38 }
 0x540   : > { %423 = vrot.lane.b32.xlu2 %v421_v46, %s681_s17 }
 0x59a   : > { %v424_v49 = vpop.permute.xlu2 %423 }
 0x59b   : > { %v426_v50 = vsub.f32 %v408_v40, %v424_v49 }
 0x59d   : > { %v431_v51 = vrot.slane %v426_v50, 7 }
 0x59f   : > { %600 = vpush %v431_v51 }
 0x5a0   : > { %602 = vpush %v433_v52 }
 0x5d0   : > { %s601_s19 = spop %600 }
 0x5d1   : > { %s603_s20 = spop %602 }
 0x5d2   : > { %s435_s21 = smul.f32 %s603_s20, %s601_s19 }
 0x5d4   : > { %v439_v17 = vstv %s435_s21  ;;  %447 = sbr.rel (%p564_p5) target bundleno = 1693 (0x69d), region = 40 }
 0x5d5   : > { %v440_v54 = vsel %vm438_vm2, %v439_v17, %v430_v47 }
 0x5d6   : > { %v441_v55 = vadd.f32 %v440_v54, %v206_v3 }
 0x5d8   : > { %443 = vst.msk [vmem:[#allocation2] sm:$0x1] %vm442_vm4, %v441_v55 }
 0x5d9   : > { %v463_v0 = vld [vmem:[#allocation3] sm:$0x1] }
 0x5df   : > { %v448_v56 = vld [vmem:[#allocation2] sm:$0x1] }
 0x5e0   : > { %v449_v48 = vmul.f32 %v448_v56, %v448_v56 }
 0x5e2   : > { %v450_v57 = vsel %vm442_vm4, %v449_v48, 0.0 }
 0x5e3   : > { %451 = vadd.xlane.f32.xlu0 %v450_v57 }
 0x656   : > { %v452_v58 = vpop.xlane.xlu0 %451 }
 0x657   : > { %v453_v59 = vrot.slane %v452_v58, 4 }
 0x659   : > { %v454_v60 = vadd.f32 %v453_v59, %v452_v58 }
 0x65b   : > { %v455_v61 = vrot.slane %v454_v60, 2 }
 0x65d   : > { %v456_v62 = vadd.f32 %v455_v61, %v454_v60 }
 0x65f   : > { %v457_v63 = vrot.slane %v456_v62, 1 }
 0x661   : > { %v458_v4 = vadd.f32 %v457_v63, %v456_v62 }
 0x663   : > { %604 = vpush %v458_v4 }
 0x694   : > { %s605_s14 = spop %604 }
 0x695   : > { %s460_s22 = smul.f32 -0.5, %s605_s14 }
 0x697   : > { %s565_s23 = sadd.f32 -58.812065, %s460_s22 }
 0x699   : > { %v462_v1 = vstv %s565_s23 }
 0x69a   : > { %v464_v5 = vsub.f32 %v462_v1, %v463_v0 }
 0x69c   : > { %465 = vst.msk [vmem:[#allocation4] sm:$0x1] %vm292_vm3, %v464_v5 }
 0x69d PF: > { %p610_p6 = scmp.eq.s32.totalorder %s709_s13, 7  ;;  %s682_s24 = smov [#allocation4]  }
 0x69e   : > { %s472_s25 = sshll.u32 %s682_s24, 4  ;;  %s474_s28 = sshll.u32 %s826_s3, 4  ;;  %s473_s25 = int_to_ptr.vmem [resolvable:$true] %s472_s25  ;;  %s475_s28 = int_to_ptr.hbm [resolvable:$true] %s474_s28 }
 0x69f   : > { %607 = dma.vmem_to_hbm [thread:$0]  (%p610_p6), %s473_s25, 16, %s475_s28, [#allocation5]  }
 0x6a0   : > { %667 = dma.done.wait (%p610_p6), [#allocation5], 16  }
 0x6a1   : > { %669 = vsyncadd (%p610_p6), [#allocation5], 4294967280 }
 0x6a2 PF: > { %s14_s12 = sadd.s32 1, %s672_s12  }
 0x6a3   : > { %p11_p7 = scmp.ge.s32.totalorder %s14_s12, 10  }
 0x6a5   :  { %13 = sbr.rel (!%p11_p7) target bundleno = 1 (0x1), region = 73 }
 0x6aa   :  { %488 = vsyncpa [#allocation5], 1 }
 0x6ab   :  { %490 = vsyncpa [#allocation5 + $0x1], 1 }

</bundles_post_ra>
